<compile_context>
chip_gen: v6e
topology: v6e:2x2x1
jax: 0.10.0
libtpu: 0.0.40
codegen_flags: <defaults>
</compile_context>

<pallas_src>
import jax
import jax.numpy as jnp
from jax.experimental import pallas as pl
from jax.experimental.pallas import tpu as pltpu


def _round_up(x, m):
    return ((x + m - 1) // m) * m


def critic_kernel(s_ref, a_ref, w1s_ref, w1a_ref, b1_ref, w2_ref, b2_ref,
                  w3t_ref, b3_ref, out_ref):
    # Layer 1 in f32 (split-W1 dot replaces torch.cat([state, action], 1)).
    h1 = (jnp.dot(s_ref[...], w1s_ref[...], preferred_element_type=jnp.float32)
          + jnp.dot(a_ref[...], w1a_ref[...], preferred_element_type=jnp.float32)
          + b1_ref[...])
    h1 = jnp.maximum(h1, 0.0)

    # Layer 2: bf16 MXU matmul, f32 accumulation.
    h2 = (jnp.dot(h1.astype(w2_ref.dtype), w2_ref[...],
                  preferred_element_type=jnp.float32)
          + b2_ref[...])
    h2 = jnp.maximum(h2, 0.0)

    # Layer 3 (H -> 1): contract H of the (1,H) w3 row against H of (tb,H) h2
    # on the MXU, giving the lane-dense (1, tb) output row directly.
    q = jax.lax.dot_general(
        w3t_ref[...], h2.astype(w3t_ref.dtype),
        dimension_numbers=(((1,), (1,)), ((), ())),
        preferred_element_type=jnp.float32)                       # (1, tb)
    out_ref[...] = (q + b3_ref[0]).astype(out_ref.dtype)


def _choose_tile(batch, tile_b):
    """Pick a batch tile: 128-lane aligned, >=2 grid steps when possible."""
    if batch <= 128:
        return batch, 1                      # single exact block, no padding
    tb = _round_up(min(tile_b, batch), 128)
    num_tiles = pl.cdiv(batch, tb)
    if num_tiles < 2:                        # v7x megacore: need >= 2 steps
        tb = _round_up(pl.cdiv(batch, 2), 128)
        num_tiles = pl.cdiv(batch, tb)
    return tb, num_tiles


def critic_forward(state, action, params, *, tile_b=1024):
    """state: (B, state_dim), action: (B, action_dim) -> value: (B, 1) f32."""
    w1, b1, w2, b2, w3, b3 = params
    B, state_dim = state.shape
    action_dim = action.shape[1]
    input_size = state_dim + action_dim
    assert w1.shape[0] == input_size
    hidden = w1.shape[1]
    assert w3.shape == (hidden, 1), "w3 must be (hidden, 1)"

    # --- weight prep (tiny, once per call) -----------------------------------
    w1_s = w1[:state_dim].astype(jnp.float32)            # (state_dim, H)
    w1_a = w1[state_dim:].astype(jnp.float32)            # (action_dim, H)
    b1_r = b1.reshape(1, hidden).astype(jnp.float32)
    w2_c = w2.astype(jnp.bfloat16)                        # (H, H) bf16 for MXU
    b2_r = b2.reshape(1, hidden).astype(jnp.float32)
    w3_t = w3.reshape(1, hidden).astype(jnp.bfloat16)     # (1, H) row
    b3_s = b3.reshape(1).astype(jnp.float32)              # SMEM scalar

    s = state.astype(jnp.float32)                         # streamed as-is
    a = action.astype(jnp.float32)

    tb, num_tiles = _choose_tile(B, tile_b)
    b_pad = num_tiles * tb

    flops = 2 * b_pad * (input_size * hidden + hidden * hidden + hidden)
    bytes_accessed = int(
        B * input_size * 4 + B * 4                         # activations in/out
        + input_size * hidden * 4 + hidden * hidden * 2    # W1 (f32), W2 (bf16)
        + 2 * hidden * 4 + hidden * 2 + 4)                 # b1, b2, w3, b3

    resident = lambda i: (0, 0)                            # weights stay put
    out = pl.pallas_call(
        critic_kernel,
        out_shape=jax.ShapeDtypeStruct((1, b_pad), jnp.float32),
        grid=(num_tiles,),
        in_specs=[
            pl.BlockSpec((tb, state_dim), lambda i: (i, 0)),       # state tile
            pl.BlockSpec((tb, action_dim), lambda i: (i, 0)),      # action tile
            pl.BlockSpec((state_dim, hidden), resident),           # W1_s
            pl.BlockSpec((action_dim, hidden), resident),          # W1_a
            pl.BlockSpec((1, hidden), resident),                   # b1
            pl.BlockSpec((hidden, hidden), resident),              # W2
            pl.BlockSpec((1, hidden), resident),                   # b2
            pl.BlockSpec((1, hidden), resident),                   # W3^T row
            pl.BlockSpec(memory_space=pltpu.MemorySpace.SMEM),     # b3 scalar
        ],
        out_specs=pl.BlockSpec((1, tb), lambda i: (0, i)),         # lane-dense
        compiler_params=pltpu.CompilerParams(
            dimension_semantics=("parallel",),    # v7x: shard batch across TCs
            vmem_limit_bytes=32 * 1024 * 1024,    # fits v7x 64 MiB / v5e scoped
        ),
        cost_estimate=pl.CostEstimate(
            flops=flops, transcendentals=0, bytes_accessed=bytes_accessed),
    )(s, a, w1_s, w1_a, b1_r, w2_c, b2_r, w3_t, b3_s)

    # (1, b_pad) -> (b_pad, 1) is a contiguous reshape; slice off padded rows.
    return out.reshape(b_pad, 1)[:B]


# ----------------------------- init + reference ------------------------------
def xavier_uniform(key, shape, dtype=jnp.float32):
    fan_in, fan_out = shape[0], shape[1]
    limit = jnp.sqrt(6.0 / (fan_in + fan_out))
    return jax.random.uniform(key, shape, dtype, minval=-limit, maxval=limit)


def init_critic_params(key, input_size, hidden_size):
    k1, k2, k3 = jax.random.split(key, 3)
    w1 = xavier_uniform(k1, (input_size, hidden_size))
    b1 = jnp.zeros((1, hidden_size), jnp.float32)
    w2 = xavier_uniform(k2, (hidden_size, hidden_size))
    b2 = jnp.zeros((1, hidden_size), jnp.float32)
    w3 = xavier_uniform(k3, (hidden_size, 1))
    b3 = jnp.zeros((1, 1), jnp.float32)
    return (w1, b1, w2, b2, w3, b3)


def critic_reference(state, action, params):
    w1, b1, w2, b2, w3, b3 = params
    x = jnp.concatenate([state, action], axis=1)
    h1 = jax.nn.relu(x @ w1 + b1)
    h2 = jax.nn.relu(h1 @ w2 + b2)
    return h2 @ w3 + b3


if __name__ == "__main__":
    key = jax.random.PRNGKey(0)
    k_state, k_action, k_params, k_state2, k_action2 = jax.random.split(key, 5)

    batch = 2
    state_dim = 6
    action_dim = 2
    input_size = state_dim + action_dim
    hidden_size = 32

    state = jax.random.normal(k_state, (batch, state_dim), jnp.float32)
    action = jax.random.normal(k_action, (batch, action_dim), jnp.float32)
    params = init_critic_params(k_params, input_size, hidden_size)

    value = critic_forward(state, action, params)
    value = jax.block_until_ready(value)
    ref = critic_reference(state, action, params)
    assert value.shape == (batch, 1)
    # W2/W3 bf16 compute with f32 accumulation vs f32 reference.
    assert jnp.allclose(value, ref, atol=5e-2, rtol=5e-2)

    # Second check: batch not divisible by the tile (ragged last block,
    # multi-step parallel grid, lane-dense multi-tile output).
    batch2 = 300
    state2 = jax.random.normal(k_state2, (batch2, state_dim), jnp.float32)
    action2 = jax.random.normal(k_action2, (batch2, action_dim), jnp.float32)
    value2 = critic_forward(state2, action2, params, tile_b=128)
    value2 = jax.block_until_ready(value2)
    ref2 = critic_reference(state2, action2, params)
    assert value2.shape == (batch2, 1)
    assert jnp.allclose(value2, ref2, atol=5e-2, rtol=5e-2)

    print("KERNEL_OK")
</pallas_src>

<mosaic_0001>
module attributes {stable_mosaic.version = 11 : i64} {
  func.func @critic_kernel(%arg0: i32, %arg1: memref<2x6xf32, #tpu.memory_space<vmem>>, %arg2: memref<2x2xf32, #tpu.memory_space<vmem>>, %arg3: memref<6x32xf32, #tpu.memory_space<vmem>>, %arg4: memref<2x32xf32, #tpu.memory_space<vmem>>, %arg5: memref<1x32xf32, #tpu.memory_space<vmem>>, %arg6: memref<32x32xbf16, #tpu.memory_space<vmem>>, %arg7: memref<1x32xf32, #tpu.memory_space<vmem>>, %arg8: memref<1x32xbf16, #tpu.memory_space<vmem>>, %arg9: memref<1xf32, #tpu.memory_space<smem>>, %arg10: memref<1x2xf32, #tpu.memory_space<vmem>>) attributes {dimension_semantics = [#tpu.dimension_semantics<parallel>], iteration_bounds = array<i64: 1>, scalar_prefetch = 0 : i64, scratch_operands = 0 : i64, tpu.core_type = #tpu.core_type<tc>, window_params = [{transform_indices = @transform_0, window_bounds = array<i64: 2, 6>}, {transform_indices = @transform_1, window_bounds = array<i64: 2, 2>}, {pipeline_mode = #tpu.pipeline_mode<synchronous>, transform_indices = @transform_2, window_bounds = array<i64: 6, 32>}, {pipeline_mode = #tpu.pipeline_mode<synchronous>, transform_indices = @transform_3, window_bounds = array<i64: 2, 32>}, {pipeline_mode = #tpu.pipeline_mode<synchronous>, transform_indices = @transform_4, window_bounds = array<i64: 1, 32>}, {pipeline_mode = #tpu.pipeline_mode<synchronous>, transform_indices = @transform_5, window_bounds = array<i64: 32, 32>}, {pipeline_mode = #tpu.pipeline_mode<synchronous>, transform_indices = @transform_6, window_bounds = array<i64: 1, 32>}, {pipeline_mode = #tpu.pipeline_mode<synchronous>, transform_indices = @transform_7, window_bounds = array<i64: 1, 32>}, {transform_indices = @transform_8, window_bounds = array<i64: 1>}, {transform_indices = @transform_9, window_bounds = array<i64: 1, 2>}]} {
    %c0 = arith.constant 0 : index
    %c0_0 = arith.constant 0 : index
    %0 = vector.load %arg1[%c0, %c0_0] : memref<2x6xf32, #tpu.memory_space<vmem>>, vector<2x6xf32>
    %c0_1 = arith.constant 0 : index
    %c0_2 = arith.constant 0 : index
    %1 = vector.load %arg3[%c0_1, %c0_2] : memref<6x32xf32, #tpu.memory_space<vmem>>, vector<6x32xf32>
    %cst = arith.constant dense<0.000000e+00> : vector<2x32xf32>
    %2 = tpu.matmul %0, %1, %cst {dimension_numbers = #tpu.dot_dimension_numbers<[1], [0], [0], [1], [0, 0, 1, 1], [], []>} : vector<2x6xf32>, vector<6x32xf32>, vector<2x32xf32> -> vector<2x32xf32>
    %c0_3 = arith.constant 0 : index
    %c0_4 = arith.constant 0 : index
    %3 = vector.load %arg2[%c0_3, %c0_4] : memref<2x2xf32, #tpu.memory_space<vmem>>, vector<2x2xf32>
    %c0_5 = arith.constant 0 : index
    %c0_6 = arith.constant 0 : index
    %4 = vector.load %arg4[%c0_5, %c0_6] : memref<2x32xf32, #tpu.memory_space<vmem>>, vector<2x32xf32>
    %cst_7 = arith.constant dense<0.000000e+00> : vector<2x32xf32>
    %5 = tpu.matmul %3, %4, %cst_7 {dimension_numbers = #tpu.dot_dimension_numbers<[1], [0], [0], [1], [0, 0, 1, 1], [], []>} : vector<2x2xf32>, vector<2x32xf32>, vector<2x32xf32> -> vector<2x32xf32>
    %6 = arith.addf %2, %5 : vector<2x32xf32>
    %c0_8 = arith.constant 0 : index
    %c0_9 = arith.constant 0 : index
    %7 = vector.load %arg5[%c0_8, %c0_9] : memref<1x32xf32, #tpu.memory_space<vmem>>, vector<1x32xf32>
    %8 = vector.broadcast %7 : vector<1x32xf32> to vector<2x32xf32>
    %9 = arith.addf %6, %8 : vector<2x32xf32>
    %cst_10 = arith.constant 0.000000e+00 : f32
    %10 = vector.broadcast %cst_10 : f32 to vector<2x32xf32>
    %11 = arith.maximumf %9, %10 : vector<2x32xf32>
    %12 = arith.truncf %11 : vector<2x32xf32> to vector<2x32xbf16>
    %c0_11 = arith.constant 0 : index
    %c0_12 = arith.constant 0 : index
    %13 = vector.load %arg6[%c0_11, %c0_12] : memref<32x32xbf16, #tpu.memory_space<vmem>>, vector<32x32xbf16>
    %cst_13 = arith.constant dense<0.000000e+00> : vector<2x32xf32>
    %14 = tpu.matmul %12, %13, %cst_13 {dimension_numbers = #tpu.dot_dimension_numbers<[1], [0], [0], [1], [0, 0, 1, 1], [], []>} : vector<2x32xbf16>, vector<32x32xbf16>, vector<2x32xf32> -> vector<2x32xf32>
    %c0_14 = arith.constant 0 : index
    %c0_15 = arith.constant 0 : index
    %15 = vector.load %arg7[%c0_14, %c0_15] : memref<1x32xf32, #tpu.memory_space<vmem>>, vector<1x32xf32>
    %16 = vector.broadcast %15 : vector<1x32xf32> to vector<2x32xf32>
    %17 = arith.addf %14, %16 : vector<2x32xf32>
    %cst_16 = arith.constant 0.000000e+00 : f32
    %18 = vector.broadcast %cst_16 : f32 to vector<2x32xf32>
    %19 = arith.maximumf %17, %18 : vector<2x32xf32>
    %c0_17 = arith.constant 0 : index
    %c0_18 = arith.constant 0 : index
    %20 = vector.load %arg8[%c0_17, %c0_18] : memref<1x32xbf16, #tpu.memory_space<vmem>>, vector<1x32xbf16>
    %21 = arith.truncf %19 : vector<2x32xf32> to vector<2x32xbf16>
    %cst_19 = arith.constant dense<0.000000e+00> : vector<1x2xf32>
    %22 = tpu.matmul %20, %21, %cst_19 {dimension_numbers = #tpu.dot_dimension_numbers<[1], [1], [0], [0], [0, 0, 1, 0], [], []>} : vector<1x32xbf16>, vector<2x32xbf16>, vector<1x2xf32> -> vector<1x2xf32>
    %c0_20 = arith.constant 0 : index
    %23 = memref.load %arg9[%c0_20] : memref<1xf32, #tpu.memory_space<smem>>
    %24 = vector.broadcast %23 : f32 to vector<1x2xf32>
    %25 = arith.addf %22, %24 : vector<1x2xf32>
    %c0_21 = arith.constant 0 : index
    %c0_22 = arith.constant 0 : index
    %26 = vector.load %arg10[%c0_21, %c0_22] : memref<1x2xf32, #tpu.memory_space<vmem>>, vector<1x2xf32>
    tpu.vector_store %arg10[%c0_21, %c0_22], %25 {strides = array<i32>} : memref<1x2xf32, #tpu.memory_space<vmem>>, vector<1x2xf32>,
    return
  }
  func.func @transform_0(%arg0: i32) -> (i32, i32) {
    %c0_i32 = arith.constant 0 : i32
    %c0_i32_0 = arith.constant 0 : i32
    return %arg0, %c0_i32 : i32, i32
  }
  func.func @transform_1(%arg0: i32) -> (i32, i32) {
    %c0_i32 = arith.constant 0 : i32
    %c0_i32_0 = arith.constant 0 : i32
    return %arg0, %c0_i32 : i32, i32
  }
  func.func @transform_2(%arg0: i32) -> (i32, i32) {
    %c0_i32 = arith.constant 0 : i32
    %c0_i32_0 = arith.constant 0 : i32
    %c0_i32_1 = arith.constant 0 : i32
    return %c0_i32, %c0_i32_0 : i32, i32
  }
  func.func @transform_3(%arg0: i32) -> (i32, i32) {
    %c0_i32 = arith.constant 0 : i32
    %c0_i32_0 = arith.constant 0 : i32
    %c0_i32_1 = arith.constant 0 : i32
    return %c0_i32, %c0_i32_0 : i32, i32
  }
  func.func @transform_4(%arg0: i32) -> (i32, i32) {
    %c0_i32 = arith.constant 0 : i32
    %c0_i32_0 = arith.constant 0 : i32
    %c0_i32_1 = arith.constant 0 : i32
    return %c0_i32, %c0_i32_0 : i32, i32
  }
  func.func @transform_5(%arg0: i32) -> (i32, i32) {
    %c0_i32 = arith.constant 0 : i32
    %c0_i32_0 = arith.constant 0 : i32
    %c0_i32_1 = arith.constant 0 : i32
    return %c0_i32, %c0_i32_0 : i32, i32
  }
  func.func @transform_6(%arg0: i32) -> (i32, i32) {
    %c0_i32 = arith.constant 0 : i32
    %c0_i32_0 = arith.constant 0 : i32
    %c0_i32_1 = arith.constant 0 : i32
    return %c0_i32, %c0_i32_0 : i32, i32
  }
  func.func @transform_7(%arg0: i32) -> (i32, i32) {
    %c0_i32 = arith.constant 0 : i32
    %c0_i32_0 = arith.constant 0 : i32
    %c0_i32_1 = arith.constant 0 : i32
    return %c0_i32, %c0_i32_0 : i32, i32
  }
  func.func @transform_8(%arg0: i32) -> i32 {
    %c0_i32 = arith.constant 0 : i32
    %c0_i32_0 = arith.constant 0 : i32
    return %c0_i32 : i32
  }
  func.func @transform_9(%arg0: i32) -> (i32, i32) {
    %c0_i32 = arith.constant 0 : i32
    %c0_i32_0 = arith.constant 0 : i32
    return %c0_i32, %arg0 : i32, i32
  }
}

</mosaic_0001>

<bundles_post_ra>
// kernel: tpu_custom_call.1
= control target key start
LH: loop header
LB: loop body
LE: loop exit
PB: predicated region body
PF: predicated region fallthrough
CT: control target
= control target key end

     0   :  { %15 = vsyncpa [#allocation4], 0  ;;  %s609_s0 = inlined_call_operand.vmem [shape: f32[2,6], index: 0, kind: input, shape index: {}]   ;;  %s610_s1 = inlined_call_operand.hbm [shape: f32[2,2], index: 1, kind: input, shape index: {}]   ;;  %s611_s2 = inlined_call_operand.hbm [shape: f32[6,32], index: 2, kind: input, shape index: {}]   ;;  %s612_s3 = inlined_call_operand.vmem [shape: f32[2,32], index: 3, kind: input, shape index: {}]   ;;  %s613_s4 = inlined_call_operand.vmem [shape: f32[1,32], index: 4, kind: input, shape index: {}]   ;;  %s614_s5 = inlined_call_operand.hbm [shape: bf16[32,32], index: 5, kind: input, shape index: {}]   ;;  %s615_s6 = inlined_call_operand.vmem [shape: f32[1,32], index: 6, kind: input, shape index: {}]   ;;  %s616_s7 = inlined_call_operand.vmem [shape: bf16[1,32], index: 7, kind: input, shape index: {}]   ;;  %s617_s8 = inlined_call_operand.<no memory space> [shape: f32[1], index: 8, kind: input, shape index: {}]   ;;  %s618_s9 = inlined_call_operand.hbm [shape: f32[1,2], index: 9, kind: output, shape index: {}]  }
   0x1   :  { %16 = vsyncpa [#allocation7], 0 }
   0x2   :  { %17 = vsyncpa [#allocation5], 0  ;;  %s517_s30 = smov [#allocation6]   ;;  %s518_s11 = smov [#allocation3]  }
   0x3   :  { %s36_s10 = sshll.u32 %s517_s30, 4  ;;  %s26_s12 = sshll.u32 %s518_s11, 4  ;;  %s37_s10 = int_to_ptr.vmem [resolvable:$true] %s36_s10  ;;  %s27_s12 = int_to_ptr.vmem [resolvable:$true] %s26_s12 }
   0x4   :  { %s439_s13 = scalar_lea.vmem %s37_s10, 128  ;;  %p444_p1 = scmp.lt.s32.totalorder %s37_s10, %s37_s10 }
   0x5   :  { %p440_p0 = scmp.ne.s32.totalorder %s37_s10, %s439_s13  ;;  %p445_p2 = scmp.lt.s32.totalorder %s439_s13, %s439_s13 }
   0x7   :  { %p446_p3 = por %p445_p2, %p444_p1 }
   0x9   :  { %p447_p4 = pnand %p446_p3, %p440_p0 }
   0xb   :  { %450 = shalt.err (!%p447_p4)
}
   0xc   :  { %39 = dma.hbm_to_vmem [thread:$0]  %s611_s2, 128, %s37_s10, [#allocation7]  }
   0xd   :  { %s459_s16 = scalar_lea.vmem %s27_s12, 32  ;;  %p464_p6 = scmp.lt.s32.totalorder %s27_s12, %s27_s12 }
   0xe   :  { %p460_p5 = scmp.ne.s32.totalorder %s27_s12, %s459_s16  ;;  %p465_p7 = scmp.lt.s32.totalorder %s459_s16, %s459_s16 }
  0x10   :  { %p466_p8 = por %p465_p7, %p464_p6 }
  0x12   :  { %p467_p9 = pnand %p466_p8, %p460_p5 }
  0x14   :  { %470 = shalt.err (!%p467_p9)
}
  0x15   :  { %29 = dma.hbm_to_vmem [thread:$0]  %s610_s1, 32, %s27_s12, [#allocation4]  }
  0x16   :  { %s519_s19 = smov [#allocation8]  }
  0x17   :  { %s49_s20 = sshll.u32 %s519_s19, 4  ;;  %s50_s20 = int_to_ptr.vmem [resolvable:$true] %s49_s20 }
  0x18   :  { %s479_s21 = scalar_lea.vmem %s50_s20, 256  ;;  %p484_p11 = scmp.lt.s32.totalorder %s50_s20, %s50_s20 }
  0x19   :  { %p480_p10 = scmp.ne.s32.totalorder %s50_s20, %s479_s21  ;;  %p485_p12 = scmp.lt.s32.totalorder %s479_s21, %s479_s21 }
  0x1b   :  { %p486_p13 = por %p485_p12, %p484_p11 }
  0x1d   :  { %p487_p0 = pnand %p486_p13, %p480_p10 }
  0x1f   :  { %490 = shalt.err (!%p487_p0)
}
  0x20   :  { %s520_s2 = smov 64   ;;  %s521_s22 = smov 4  }
  0x21   :  { %55 = dma.hbm_to_vmem [thread:$0]  %s614_s5, 256, %s50_s20, [#allocation7], %s520_s2, %s520_s2, %s521_s22  }
  0x22   :  { %511 = dma.done.wait [#allocation4], 32  }
  0x23   :  { %512 = vsyncadd [#allocation4], 4294967264 }
  0x24   :  { %513 = dma.done.wait [#allocation7], 384  }
  0x25   :  { %514 = vsyncadd [#allocation7], 4294966912  ;;  %v522_v0 = vmov 0.0   ;;  %vm523_vm0 = vmmov 0   ;;  %vm80_vm1 = vcmask 1041408   ;;  %vm158_vm2 = vcmask 1045504  }
  0x26   :  { %397 = vmatprep.subr.mxu0 %v522_v0  ;;  %402 = vmatprep.subr.mxu1 %v522_v0  ;;  %vm76_vm3 = vcmask 15360   ;;  %vm154_vm4 = vcmask 48128   ;;  %v75_v1 = vld [vmem:[%s612_s3] sm:$0x3]  ;;  %v73_v2 = vld [vmem:[#allocation6] sm:$0x3f]  ;;  %v313_v26 = vstv %s617_s8 }
  0x27   :  { %399 = vmatprep.mubr.msk.f32.mxu0 %vm523_vm0, %v522_v0  ;;  %404 = vmatprep.mubr.msk.f32.mxu1 %vm523_vm0, %v522_v0  ;;  %v74_v3 = vld [vmem:[#allocation3] sm:$0x3]  ;;  %v429_v5 = vld [vmem:[#allocation8 + $0x8] sm:$0xff]   ;;  %v430_v6 = vld [vmem:[#allocation8] sm:$0xff]   ;;  %vm265_vm5 = vcmask 261120   ;;  %s524_s11 = smov [#allocation9]  }
  0x28   :  { %398 = vmatpush3.msk.msra.mxu0 %vm80_vm1, %v75_v1  ;;  %403 = vmatpush3.msk.msra.mxu1 %vm158_vm2, %v73_v2  ;;  %v72_v4 = vld [vmem:[%s609_s0] sm:$0x3]  ;;  %vm360_vm6 = vcmask 8192  }
  0x29   :  { %400 = vmatmul.mubr.msk.f32.vlgmr.msra.gmra.mxu0 %vm76_vm3, %v74_v3  ;;  %405 = vmatmul.mubr.msk.f32.vlgmr.msra.gmra.mxu1 %vm154_vm4, %v72_v4  ;;  %v382_v9 = vld [vmem:[%s613_s4] ss:$0 sm:$0xff] }
  0x2a   :  { %407 = vmatprep.subr.bf16.mxu0 %v522_v0  ;;  %411 = vmatprep.mubr.msk.bf16.mxu0 %vm523_vm0, %v522_v0  ;;  %v383_v16 = vld [vmem:[%s615_s6] ss:$0 sm:$0xff]  ;;  %s368_s6 = sshll.u32 %s524_s11, 4  ;;  %s369_s6 = int_to_ptr.vmem [resolvable:$true] %s368_s6 }
  0x2b   :  { %415 = vmatprep.subr.bf16.mxu1 %v522_v0  ;;  %417 = vmatprep.mubr.msk.bf16.mxu1 %vm523_vm0, %v522_v0  ;;  %v310_v25 = vld [vmem:[%s616_s7] sm:$0x1]  ;;  %s491_s12 = scalar_lea.vmem %s369_s6, 16  ;;  %s495_s13 = scalar_lea.vmem %s369_s6, 32 }
  0x2c   :  { %408 = vmatpush3.bf16.msra.mxu0 %v429_v5  ;;  %p492_p1 = scmp.ne.s32.totalorder %s369_s6, %s491_s12  ;;  %p496_p2 = scmp.lt.s32.totalorder %s369_s6, %s369_s6 }
  0x2d   :  { %409 = vmatprep.subr.bf16.mxu0 %v522_v0  ;;  %p497_p3 = scmp.lt.s32.totalorder %s495_s13, %s491_s12 }
  0x2f   :  { %p498_p4 = por %p497_p3, %p496_p2 }
  0x30   :  { %410 = vmatpush3.bf16.msra.mxu0 %v430_v6 }
  0x31   :  { %p499_p5 = pnand %p498_p4, %p492_p1 }
  0xe9   :  { %v150_v7 = vpop.f32.mrf.mxu0  ;;  %v228_v8 = vpop.f32.mrf.mxu1 }
  0xea   :  { %v229_v10 = vadd.f32 %v228_v8, %v150_v7 }
  0xeb   :  { %v401_v11 = vpop.f32.mrf.mxu0  ;;  %v406_v12 = vpop.f32.mrf.mxu1 }
  0xec   :  { %v239_v13 = vadd.f32 %v382_v9, %v229_v10 }
  0xee   :  { %v240_v14 = vmax.f32 %v239_v13, 0.0 }
  0xf0   :  { %v241_v15 = vpack.c.bf16 %v240_v14, %v240_v14 }
  0xf2   :  { %412 = vmatmul.mubr.msk.bf16.vlgmr.msra.gmra.mxu0 %vm265_vm5, %v241_v15 }
 0x1b2   :  { %v303_v17 = vpop.f32.mrf.mxu0 }
 0x1b3   :  { %v304_v18 = vadd.f32 %v383_v16, %v303_v17 }
 0x1b4   :  { %v413_v19 = vpop.f32.mrf.mxu0 }
 0x1b5   :  { %v309_v20 = vmax.f32 %v304_v18, 0.0 }
 0x1b6   :  { %v306_v21 = vpop.f32.mrf.mxu0 }
 0x1b7   :  { %v311_v22 = vpack.c.bf16 %v309_v20, %v309_v20 }
 0x1b8   :  { %v414_v23 = vpop.f32.mrf.mxu0 }
 0x1b9   :  { %v318_v24 = vsel %vm265_vm5, %v311_v22, 0 }
 0x1ba   :  { %416 = vmatpush3.bf16.xpose.msra.mxu1 %v318_v24 }
 0x1c1   :  { %418 = vmatmul.mubr.msk.bf16.vlgmr.msra.gmra.mxu1 %vm265_vm5, %v310_v25 }
 0x281   :  { %v354_v27 = vpop.f32.mrf.mxu1 }
 0x282   :  { %v355_v28 = vadd.f32 %v354_v27, %v313_v26 }
 0x283   :  { %v419_v29 = vpop.f32.mrf.mxu1 }
 0x284   :  { %361 = vst.msk [vmem:[#allocation9] sm:$0x1] %vm360_vm6, %v355_v28 }
 0x285   :  { %v357_v30 = vpop.f32.mrf.mxu1 }
 0x286   :  { %502 = shalt.err (!%p499_p5)
}
 0x287   :  { %371 = dma.vmem_to_hbm [thread:$0]  %s369_s6, 16, %s618_s9, [#allocation5]   ;;  %v420_v31 = vpop.f32.mrf.mxu1 }
 0x288   :  { %515 = dma.done.wait [#allocation5], 16  }
 0x289   :  { %516 = vsyncadd [#allocation5], 4294967280 }
 0x28a   :  { %375 = vsyncpa [#allocation4], 1 }
 0x28b   :  { %376 = vsyncpa [#allocation7], 1 }
 0x28c   :  { %377 = vsyncpa [#allocation5], 1 }

</bundles_post_ra>
